<compile_context>
chip_gen: v5e
topology: v5e:2x2
jax: 0.10.0
libtpu: 0.0.40
codegen_flags: <defaults>
</compile_context>

<pallas_src>
import functools

import jax
import jax.numpy as jnp
from jax.experimental import pallas as pl
from jax.experimental.pallas import tpu as pltpu


def _ceil(a, b):
    return (a + b - 1) // b * b


# ----------------------------------------------------------------------------
# Fused Pallas kernel: entire GraphGCNEncoder forward in one invocation
# ----------------------------------------------------------------------------
def _fused_encoder_kernel(cfg, eps_ref, adj_ref, x_ref, w_ref, b_ref, out_ref):
    """Fused forward for the whole (sublane-padded) batch.

    Node-major row ordering: row r = n * Bp + b, so with Bp a multiple of 8 the
    per-node row-block across the batch is a full-sublane, tile-aligned slice.

    Refs:
      eps_ref : (n_gin,)        SMEM   per-GIN-layer eps
      adj_ref : (N*Bp, N*Bp)    VMEM   block-diagonal adjacency (no self term)
      x_ref   : (N*Bp, Fp)      VMEM   node features (feature dim zero-padded to 8)
      w_ref   : (W_ROWS, 128)   VMEM   packed weight slab (static row slices)
      b_ref   : (8k, 128)       VMEM   packed bias slab   (one bias per row)
      out_ref : (Bp, out_lanes) VMEM   [mean || softplus-pre-act std || pad]
    """
    n_gin = cfg["n_gin"]
    n_mlp = cfg["n_mlp"]
    n_nodes = cfg["n_nodes"]
    hid = cfg["hidden"]
    latent = cfg["latent"]
    w_sl = cfg["w_slices"]
    b_sl = cfg["b_slices"]

    def weight(i):
        off, rows, cols = w_sl[i]
        return w_ref[off:off + rows, :cols]

    def bias(i):
        row, cols = b_sl[i]
        return b_ref[row:row + 1, :cols]

    adj = adj_ref[...]                      # load once, reused by every GIN layer
    h = x_ref[...]
    wi = 0
    bi = 0

    # ---- GIN conv layers: h' = ReLU(MLP((1+eps) h + A h)) -------------------
    for l in range(n_gin):
        agg = jnp.dot(adj, h, preferred_element_type=jnp.float32)
        agg = agg + (1.0 + eps_ref[l]) * h            # eps from SMEM, rides the VPU slot
        y = jnp.dot(agg, weight(wi), preferred_element_type=jnp.float32) + bias(bi)
        y = jnp.maximum(y, 0.0)
        h = jnp.dot(y, weight(wi + 1), preferred_element_type=jnp.float32) + bias(bi + 1)
        h = jnp.maximum(h, 0.0)
        wi += 2
        bi += 2

    # ---- Flatten + MLP layer 0 (gin_out projection folded into the weight) --
    # feat[b, :] = sum_n h[n*Bp + b, :] @ W0'_n.  With Bp % 8 == 0 each slice is a
    # full-sublane aligned (Bp, hid) block, so every MXU push uses dense sublanes.
    # TODO(synk): a single (Bp, N*hid) @ (N*hid, M) contraction would additionally
    #             need a rows->lanes relayout of h; kept as aligned per-node
    #             accumulation until that Mosaic reshape path is verified everywhere.
    off0, _, m0 = w_sl[wi]
    batch_p = h.shape[0] // n_nodes
    feat = jnp.zeros((batch_p, m0), jnp.float32)
    for n in range(n_nodes):
        h_n = h[n * batch_p:(n + 1) * batch_p, :]                    # (Bp, hid) aligned
        w_n = w_ref[off0 + n * hid: off0 + (n + 1) * hid, :m0]       # (hid, M) static slice
        feat = feat + jnp.dot(h_n, w_n, preferred_element_type=jnp.float32)
    feat = jnp.maximum(feat + bias(bi), 0.0)
    wi += 1
    bi += 1

    # ---- remaining MLP layers (ReLU on every layer) --------------------------
    for _ in range(1, n_mlp):
        feat = jnp.dot(feat, weight(wi), preferred_element_type=jnp.float32) + bias(bi)
        feat = jnp.maximum(feat, 0.0)
        wi += 1
        bi += 1

    # ---- fused mean / std heads, full-lane (unmasked) store -------------------
    z = jnp.dot(feat, weight(wi), preferred_element_type=jnp.float32) + bias(bi)
    col = jax.lax.broadcasted_iota(jnp.int32, z.shape, 1)
    out_ref[...] = jnp.where(col < latent, z, jnp.logaddexp(z, 0.0)).astype(out_ref.dtype)


# ----------------------------------------------------------------------------
# Host-side packing helpers (2 DMAs instead of ~19 sub-KB ones)
# ----------------------------------------------------------------------------
def _pack_weights(mats):
    """Stack 2-D matrices into one (rows, lanes) f32 slab; rows 8-padded per matrix."""
    lanes = _ceil(max(int(m.shape[1]) for m in mats), 128)
    pieces, slices, off = [], [], 0
    for m in mats:
        r, c = int(m.shape[0]), int(m.shape[1])
        rp = _ceil(r, 8)
        piece = jnp.zeros((rp, lanes), jnp.float32).at[:r, :c].set(m.astype(jnp.float32))
        pieces.append(piece)
        slices.append((off, r, c))
        off += rp
    return jnp.concatenate(pieces, axis=0), tuple(slices)


def _pack_biases(vecs):
    """One bias vector per row of an (8k, lanes) f32 slab."""
    lanes = _ceil(max(int(v.shape[-1]) for v in vecs), 128)
    rows = _ceil(len(vecs), 8)
    buf = jnp.zeros((rows, lanes), jnp.float32)
    slices = []
    for i, v in enumerate(vecs):
        v = v.reshape(-1).astype(jnp.float32)
        buf = buf.at[i, :v.shape[0]].set(v)
        slices.append((i, int(v.shape[0])))
    return buf, tuple(slices)


# ----------------------------------------------------------------------------
# Wrapper
# ----------------------------------------------------------------------------
def graph_gcn_encoder_forward(params, adj, feats):
    """adj: (B, N, N) float32, no self loops. feats: (B, N, F) float32."""
    B, N, F = feats.shape
    Bp = _ceil(B, 8)           # sublane-align the batch (f32 tile is (8, 128))
    Fp = _ceil(F, 8)

    gin = params["gin_layers"]
    mlp = params["mlp"]
    n_gin, n_mlp = len(gin), len(mlp)
    hid = int(gin[-1]["w2"].shape[1])
    latent = int(params["mean_w"].shape[1])
    out_lanes = _ceil(max(2 * latent, 128), 128)
    hp = jax.lax.Precision.HIGHEST

    # ---- batch padding + node-major layout -----------------------------------
    feats_p = jnp.zeros((Bp, N, F), jnp.float32).at[:B].set(feats)
    adj_p = jnp.zeros((Bp, N, N), jnp.float32).at[:B].set(adj)
    # x_big[n*Bp + b, :] = feats[b, n, :]
    x_big = jnp.transpose(feats_p, (1, 0, 2)).reshape(N * Bp, F)
    x_big = jnp.zeros((N * Bp, Fp), jnp.float32).at[:, :F].set(x_big)
    # Single block-diagonal adjacency: A_big[n*Bp+b, m*Bp+c] = adj[b,n,m] * delta(b,c).
    # (Pure broadcast-multiply, no contraction -> exact at any precision.)
    adj_big = jnp.einsum("bnm,bc->nbmc", adj_p,
                         jnp.eye(Bp, dtype=jnp.float32)).reshape(N * Bp, N * Bp)

    eps = jnp.stack([jnp.asarray(lp["eps"], jnp.float32) for lp in gin])     # (n_gin,)

    # ---- fold gin_out projection into MLP layer 0 (exact) --------------------
    gow, gob = params["gin_out_w"], params["gin_out_b"]      # (hid, G), (1, G)
    G = gow.shape[1]
    W0, b0 = mlp[0]                                          # (N*G, M0), (1, M0)
    M0 = W0.shape[1]
    W0_blocks = W0.reshape(N, G, M0)
    W0_fused = jnp.einsum("hg,ngm->nhm", gow, W0_blocks,
                          precision=hp).reshape(N * hid, M0)
    b0_fused = b0 + jnp.einsum("g,ngm->m", gob[0], W0_blocks, precision=hp)[None, :]

    # GIN layer-0 input weight rows padded F -> Fp to match the padded features.
    w1_0 = jnp.zeros((Fp, gin[0]["w1"].shape[1]), jnp.float32).at[:F].set(gin[0]["w1"])

    # ---- fused mean/std head, padded to a full 128-lane store ----------------
    head_w = jnp.concatenate([params["mean_w"], params["std_w"]], axis=1)
    head_b = jnp.concatenate([params["mean_b"], params["std_b"]], axis=1)
    head_w = jnp.zeros((head_w.shape[0], out_lanes), jnp.float32).at[:, :2 * latent].set(head_w)
    head_b = jnp.zeros((1, out_lanes), jnp.float32).at[:, :2 * latent].set(head_b)

    # ---- pack all weights / biases into two slabs -----------------------------
    w_mats = [w1_0, gin[0]["w2"]]
    b_vecs = [gin[0]["b1"], gin[0]["b2"]]
    for lp in gin[1:]:
        w_mats += [lp["w1"], lp["w2"]]
        b_vecs += [lp["b1"], lp["b2"]]
    w_mats.append(W0_fused)
    b_vecs.append(b0_fused)
    for w, b in mlp[1:]:
        w_mats.append(w)
        b_vecs.append(b)
    w_mats.append(head_w)
    b_vecs.append(head_b)
    w_pack, w_slices = _pack_weights(w_mats)
    b_pack, b_slices = _pack_biases(b_vecs)

    cfg = dict(n_gin=n_gin, n_mlp=n_mlp, n_nodes=N, hidden=hid, latent=latent,
               w_slices=w_slices, b_slices=b_slices)
    kernel = functools.partial(_fused_encoder_kernel, cfg)

    vmem_spec = pl.BlockSpec(memory_space=pltpu.MemorySpace.VMEM)
    smem_spec = pl.BlockSpec(memory_space=pltpu.MemorySpace.SMEM)
    out = pl.pallas_call(
        kernel,
        out_shape=jax.ShapeDtypeStruct((Bp, out_lanes), jnp.float32),
        in_specs=[smem_spec, vmem_spec, vmem_spec, vmem_spec, vmem_spec],
        out_specs=vmem_spec,
        compiler_params=pltpu.CompilerParams(vmem_limit_bytes=32 * 1024 * 1024),
    )(eps, adj_big, x_big, w_pack, b_pack)
    return out[:B, :latent], out[:B, latent:2 * latent]


# ----------------------------------------------------------------------------
# Parameter construction (deterministic, PyTorch nn.Linear-style init)
# ----------------------------------------------------------------------------
def _init_linear(key, fan_in, fan_out):
    kw, kb = jax.random.split(key)
    bound = 1.0 / jnp.sqrt(fan_in)
    w = jax.random.uniform(kw, (fan_in, fan_out), jnp.float32, -bound, bound)
    b = jax.random.uniform(kb, (1, fan_out), jnp.float32, -bound, bound)
    return w, b


def make_params(key, *, num_attrs, gnn_hidden, gnn_out, n_nodes,
                mlp_hidden, mlp_num_layers, bottleneck, latent):
    keys = jax.random.split(key, 16)
    ki = iter(keys)

    # GIN conv layers: layer 0 maps F -> hidden -> hidden, layer 1 hidden -> hidden -> hidden
    gin_layers = []
    dims = [num_attrs, gnn_hidden]
    for lyr in range(2):  # config.gnn.num_layers = 2
        din = dims[lyr]
        w1, b1 = _init_linear(next(ki), din, gnn_hidden)
        w2, b2 = _init_linear(next(ki), gnn_hidden, gnn_hidden)
        gin_layers.append(dict(w1=w1, b1=b1, w2=w2, b2=b2, eps=jnp.float32(0.0)))

    # per-node output projection to gnn output_dim (= config.mlp.hidden_dim)
    gin_out_w, gin_out_b = _init_linear(next(ki), gnn_hidden, gnn_out)

    # MLP after flatten: [n_nodes*gnn_out, mlp_hidden*(num_layers-1)..., bottleneck], ReLU
    mlp_dims = [n_nodes * gnn_out] + [mlp_hidden] * (mlp_num_layers - 1) + [bottleneck]
    mlp = []
    for din, dout in zip(mlp_dims[:-1], mlp_dims[1:]):
        mlp.append(_init_linear(next(ki), din, dout))

    mean_w, mean_b = _init_linear(next(ki), bottleneck, latent)
    std_w, std_b = _init_linear(next(ki), bottleneck, latent)

    return dict(gin_layers=gin_layers, gin_out_w=gin_out_w, gin_out_b=gin_out_b,
                mlp=mlp, mean_w=mean_w, mean_b=mean_b, std_w=std_w, std_b=std_b)


# ----------------------------------------------------------------------------
# Pure-JAX reference (for correctness check)
# ----------------------------------------------------------------------------
def _reference_forward(params, adj, feats):
    h = feats                                              # (B, N, F)
    for lp in params["gin_layers"]:
        agg = jnp.einsum("bnm,bmf->bnf", adj, h) + (1.0 + lp["eps"]) * h
        y = jnp.maximum(jnp.einsum("bnf,fh->bnh", agg, lp["w1"]) + lp["b1"], 0.0)
        h = jnp.maximum(jnp.einsum("bnh,hk->bnk", y, lp["w2"]) + lp["b2"], 0.0)
    h = jnp.einsum("bnh,hg->bng", h, params["gin_out_w"]) + params["gin_out_b"]
    B, N, G = h.shape
    feat = h.reshape(B, N * G)
    for w, b in params["mlp"]:
        feat = jnp.maximum(feat @ w + b, 0.0)
    mean = feat @ params["mean_w"] + params["mean_b"]
    std = jax.nn.softplus(feat @ params["std_w"] + params["std_b"])
    return mean, std


# ----------------------------------------------------------------------------
if __name__ == "__main__":
    # synthetic config
    B = 2            # batch of graphs
    N = 8            # shared_params.graph_max_nodes
    F = 4            # len(config.attributes)
    GNN_HIDDEN = 32  # config.gnn.layer_dim
    GNN_OUT = 32     # config.mlp.hidden_dim (per-node GIN output dim)
    MLP_HIDDEN = 32
    MLP_NUM_LAYERS = 2
    BOTTLENECK = 32  # config.mlp.bottleneck_dim
    LATENT = 16      # shared_params.latent_dim

    key = jax.random.PRNGKey(0)
    k_params, k_adj, k_feat = jax.random.split(key, 3)

    params = make_params(k_params, num_attrs=F, gnn_hidden=GNN_HIDDEN,
                         gnn_out=GNN_OUT, n_nodes=N, mlp_hidden=MLP_HIDDEN,
                         mlp_num_layers=MLP_NUM_LAYERS, bottleneck=BOTTLENECK,
                         latent=LATENT)

    # random symmetric adjacency without self-loops
    a = (jax.random.uniform(k_adj, (B, N, N)) < 0.4).astype(jnp.float32)
    adj = jnp.clip(a + jnp.transpose(a, (0, 2, 1)), 0.0, 1.0)
    eye = jnp.eye(N, dtype=jnp.float32)[None]
    adj = adj * (1.0 - eye)

    feats = jax.random.normal(k_feat, (B, N, F), jnp.float32)

    mean, std = graph_gcn_encoder_forward(params, adj, feats)
    mean = jax.block_until_ready(mean)
    std = jax.block_until_ready(std)

    assert mean.shape == (B, LATENT) and std.shape == (B, LATENT)
    assert bool(jnp.all(std > 0.0))          # Softplus output is strictly positive
    assert bool(jnp.all(jnp.isfinite(mean))) and bool(jnp.all(jnp.isfinite(std)))

    # correctness vs. pure-JAX reference
    with jax.default_matmul_precision("highest"):
        ref_mean, ref_std = _reference_forward(params, adj, feats)
    assert bool(jnp.allclose(mean, ref_mean, atol=5e-3, rtol=5e-3))
    assert bool(jnp.allclose(std, ref_std, atol=5e-3, rtol=5e-3))

    print("KERNEL_OK")
</pallas_src>

<mosaic_0001>
module attributes {stable_mosaic.version = 11 : i64} {
  func.func @_fused_encoder_kernel(%arg0: memref<2xf32, #tpu.memory_space<smem>>, %arg1: memref<64x64xf32, #tpu.memory_space<vmem>>, %arg2: memref<64x8xf32, #tpu.memory_space<vmem>>, %arg3: memref<424x128xf32, #tpu.memory_space<vmem>>, %arg4: memref<8x128xf32, #tpu.memory_space<vmem>>, %arg5: memref<8x128xf32, #tpu.memory_space<vmem>>) attributes {dimension_semantics = [], scalar_prefetch = 0 : i64, scratch_operands = 0 : i64, tpu.core_type = #tpu.core_type<tc>} {
    %c0 = arith.constant 0 : index
    %c0_0 = arith.constant 0 : index
    %0 = vector.load %arg1[%c0, %c0_0] : memref<64x64xf32, #tpu.memory_space<vmem>>, vector<64x64xf32>
    %c0_1 = arith.constant 0 : index
    %c0_2 = arith.constant 0 : index
    %1 = vector.load %arg2[%c0_1, %c0_2] : memref<64x8xf32, #tpu.memory_space<vmem>>, vector<64x8xf32>
    %cst = arith.constant dense<0.000000e+00> : vector<64x8xf32>
    %2 = tpu.matmul %0, %1, %cst {dimension_numbers = #tpu.dot_dimension_numbers<[1], [0], [0], [1], [0, 0, 1, 1], [], []>} : vector<64x64xf32>, vector<64x8xf32>, vector<64x8xf32> -> vector<64x8xf32>
    %c0_3 = arith.constant 0 : index
    %3 = memref.load %arg0[%c0_3] : memref<2xf32, #tpu.memory_space<smem>>
    %cst_4 = arith.constant 1.000000e+00 : f32
    %4 = arith.addf %cst_4, %3 : f32
    %5 = vector.broadcast %4 : f32 to vector<64x8xf32>
    %6 = arith.mulf %5, %1 : vector<64x8xf32>
    %7 = arith.addf %2, %6 : vector<64x8xf32>
    %c0_5 = arith.constant 0 : index
    %c0_6 = arith.constant 0 : index
    %8 = vector.load %arg3[%c0_5, %c0_6] : memref<424x128xf32, #tpu.memory_space<vmem>>, vector<8x32xf32>
    %cst_7 = arith.constant dense<0.000000e+00> : vector<64x32xf32>
    %9 = tpu.matmul %7, %8, %cst_7 {dimension_numbers = #tpu.dot_dimension_numbers<[1], [0], [0], [1], [0, 0, 1, 1], [], []>} : vector<64x8xf32>, vector<8x32xf32>, vector<64x32xf32> -> vector<64x32xf32>
    %c0_8 = arith.constant 0 : index
    %c0_9 = arith.constant 0 : index
    %10 = vector.load %arg4[%c0_8, %c0_9] : memref<8x128xf32, #tpu.memory_space<vmem>>, vector<1x32xf32>
    %11 = vector.broadcast %10 : vector<1x32xf32> to vector<64x32xf32>
    %12 = arith.addf %9, %11 : vector<64x32xf32>
    %cst_10 = arith.constant 0.000000e+00 : f32
    %13 = vector.broadcast %cst_10 : f32 to vector<64x32xf32>
    %14 = arith.maximumf %12, %13 : vector<64x32xf32>
    %c8 = arith.constant 8 : index
    %c0_11 = arith.constant 0 : index
    %15 = vector.load %arg3[%c8, %c0_11] : memref<424x128xf32, #tpu.memory_space<vmem>>, vector<32x32xf32>
    %cst_12 = arith.constant dense<0.000000e+00> : vector<64x32xf32>
    %16 = tpu.matmul %14, %15, %cst_12 {dimension_numbers = #tpu.dot_dimension_numbers<[1], [0], [0], [1], [0, 0, 1, 1], [], []>} : vector<64x32xf32>, vector<32x32xf32>, vector<64x32xf32> -> vector<64x32xf32>
    %c1 = arith.constant 1 : index
    %c0_13 = arith.constant 0 : index
    %17 = vector.load %arg4[%c1, %c0_13] : memref<8x128xf32, #tpu.memory_space<vmem>>, vector<1x32xf32>
    %18 = vector.broadcast %17 : vector<1x32xf32> to vector<64x32xf32>
    %19 = arith.addf %16, %18 : vector<64x32xf32>
    %cst_14 = arith.constant 0.000000e+00 : f32
    %20 = vector.broadcast %cst_14 : f32 to vector<64x32xf32>
    %21 = arith.maximumf %19, %20 : vector<64x32xf32>
    %cst_15 = arith.constant dense<0.000000e+00> : vector<64x32xf32>
    %22 = tpu.matmul %0, %21, %cst_15 {dimension_numbers = #tpu.dot_dimension_numbers<[1], [0], [0], [1], [0, 0, 1, 1], [], []>} : vector<64x64xf32>, vector<64x32xf32>, vector<64x32xf32> -> vector<64x32xf32>
    %c1_16 = arith.constant 1 : index
    %23 = memref.load %arg0[%c1_16] : memref<2xf32, #tpu.memory_space<smem>>
    %cst_17 = arith.constant 1.000000e+00 : f32
    %24 = arith.addf %cst_17, %23 : f32
    %25 = vector.broadcast %24 : f32 to vector<64x32xf32>
    %26 = arith.mulf %25, %21 : vector<64x32xf32>
    %27 = arith.addf %22, %26 : vector<64x32xf32>
    %c40 = arith.constant 40 : index
    %c0_18 = arith.constant 0 : index
    %28 = vector.load %arg3[%c40, %c0_18] : memref<424x128xf32, #tpu.memory_space<vmem>>, vector<32x32xf32>
    %cst_19 = arith.constant dense<0.000000e+00> : vector<64x32xf32>
    %29 = tpu.matmul %27, %28, %cst_19 {dimension_numbers = #tpu.dot_dimension_numbers<[1], [0], [0], [1], [0, 0, 1, 1], [], []>} : vector<64x32xf32>, vector<32x32xf32>, vector<64x32xf32> -> vector<64x32xf32>
    %c2 = arith.constant 2 : index
    %c0_20 = arith.constant 0 : index
    %30 = vector.load %arg4[%c2, %c0_20] : memref<8x128xf32, #tpu.memory_space<vmem>>, vector<1x32xf32>
    %31 = vector.broadcast %30 : vector<1x32xf32> to vector<64x32xf32>
    %32 = arith.addf %29, %31 : vector<64x32xf32>
    %cst_21 = arith.constant 0.000000e+00 : f32
    %33 = vector.broadcast %cst_21 : f32 to vector<64x32xf32>
    %34 = arith.maximumf %32, %33 : vector<64x32xf32>
    %c72 = arith.constant 72 : index
    %c0_22 = arith.constant 0 : index
    %35 = vector.load %arg3[%c72, %c0_22] : memref<424x128xf32, #tpu.memory_space<vmem>>, vector<32x32xf32>
    %cst_23 = arith.constant dense<0.000000e+00> : vector<64x32xf32>
    %36 = tpu.matmul %34, %35, %cst_23 {dimension_numbers = #tpu.dot_dimension_numbers<[1], [0], [0], [1], [0, 0, 1, 1], [], []>} : vector<64x32xf32>, vector<32x32xf32>, vector<64x32xf32> -> vector<64x32xf32>
    %c3 = arith.constant 3 : index
    %c0_24 = arith.constant 0 : index
    %37 = vector.load %arg4[%c3, %c0_24] : memref<8x128xf32, #tpu.memory_space<vmem>>, vector<1x32xf32>
    %38 = vector.broadcast %37 : vector<1x32xf32> to vector<64x32xf32>
    %39 = arith.addf %36, %38 : vector<64x32xf32>
    %cst_25 = arith.constant 0.000000e+00 : f32
    %40 = vector.broadcast %cst_25 : f32 to vector<64x32xf32>
    %41 = arith.maximumf %39, %40 : vector<64x32xf32>
    %cst_26 = arith.constant 0.000000e+00 : f32
    %42 = vector.broadcast %cst_26 : f32 to vector<8x32xf32>
    %43 = vector.extract_strided_slice %41 {offsets = [0, 0], sizes = [8, 32], strides = [1, 1]} : vector<64x32xf32> to vector<8x32xf32>
    %c104 = arith.constant 104 : index
    %c0_27 = arith.constant 0 : index
    %44 = vector.load %arg3[%c104, %c0_27] : memref<424x128xf32, #tpu.memory_space<vmem>>, vector<32x32xf32>
    %cst_28 = arith.constant dense<0.000000e+00> : vector<8x32xf32>
    %45 = tpu.matmul %43, %44, %cst_28 {dimension_numbers = #tpu.dot_dimension_numbers<[1], [0], [0], [1], [0, 0, 1, 1], [], []>} : vector<8x32xf32>, vector<32x32xf32>, vector<8x32xf32> -> vector<8x32xf32>
    %46 = arith.addf %42, %45 : vector<8x32xf32>
    %47 = vector.extract_strided_slice %41 {offsets = [8, 0], sizes = [8, 32], strides = [1, 1]} : vector<64x32xf32> to vector<8x32xf32>
    %c136 = arith.constant 136 : index
    %c0_29 = arith.constant 0 : index
    %48 = vector.load %arg3[%c136, %c0_29] : memref<424x128xf32, #tpu.memory_space<vmem>>, vector<32x32xf32>
    %cst_30 = arith.constant dense<0.000000e+00> : vector<8x32xf32>
    %49 = tpu.matmul %47, %48, %cst_30 {dimension_numbers = #tpu.dot_dimension_numbers<[1], [0], [0], [1], [0, 0, 1, 1], [], []>} : vector<8x32xf32>, vector<32x32xf32>, vector<8x32xf32> -> vector<8x32xf32>
    %50 = arith.addf %46, %49 : vector<8x32xf32>
    %51 = vector.extract_strided_slice %41 {offsets = [16, 0], sizes = [8, 32], strides = [1, 1]} : vector<64x32xf32> to vector<8x32xf32>
    %c168 = arith.constant 168 : index
    %c0_31 = arith.constant 0 : index
    %52 = vector.load %arg3[%c168, %c0_31] : memref<424x128xf32, #tpu.memory_space<vmem>>, vector<32x32xf32>
    %cst_32 = arith.constant dense<0.000000e+00> : vector<8x32xf32>
    %53 = tpu.matmul %51, %52, %cst_32 {dimension_numbers = #tpu.dot_dimension_numbers<[1], [0], [0], [1], [0, 0, 1, 1], [], []>} : vector<8x32xf32>, vector<32x32xf32>, vector<8x32xf32> -> vector<8x32xf32>
    %54 = arith.addf %50, %53 : vector<8x32xf32>
    %55 = vector.extract_strided_slice %41 {offsets = [24, 0], sizes = [8, 32], strides = [1, 1]} : vector<64x32xf32> to vector<8x32xf32>
    %c200 = arith.constant 200 : index
    %c0_33 = arith.constant 0 : index
    %56 = vector.load %arg3[%c200, %c0_33] : memref<424x128xf32, #tpu.memory_space<vmem>>, vector<32x32xf32>
    %cst_34 = arith.constant dense<0.000000e+00> : vector<8x32xf32>
    %57 = tpu.matmul %55, %56, %cst_34 {dimension_numbers = #tpu.dot_dimension_numbers<[1], [0], [0], [1], [0, 0, 1, 1], [], []>} : vector<8x32xf32>, vector<32x32xf32>, vector<8x32xf32> -> vector<8x32xf32>
    %58 = arith.addf %54, %57 : vector<8x32xf32>
    %59 = vector.extract_strided_slice %41 {offsets = [32, 0], sizes = [8, 32], strides = [1, 1]} : vector<64x32xf32> to vector<8x32xf32>
    %c232 = arith.constant 232 : index
    %c0_35 = arith.constant 0 : index
    %60 = vector.load %arg3[%c232, %c0_35] : memref<424x128xf32, #tpu.memory_space<vmem>>, vector<32x32xf32>
    %cst_36 = arith.constant dense<0.000000e+00> : vector<8x32xf32>
    %61 = tpu.matmul %59, %60, %cst_36 {dimension_numbers = #tpu.dot_dimension_numbers<[1], [0], [0], [1], [0, 0, 1, 1], [], []>} : vector<8x32xf32>, vector<32x32xf32>, vector<8x32xf32> -> vector<8x32xf32>
    %62 = arith.addf %58, %61 : vector<8x32xf32>
    %63 = vector.extract_strided_slice %41 {offsets = [40, 0], sizes = [8, 32], strides = [1, 1]} : vector<64x32xf32> to vector<8x32xf32>
    %c264 = arith.constant 264 : index
    %c0_37 = arith.constant 0 : index
    %64 = vector.load %arg3[%c264, %c0_37] : memref<424x128xf32, #tpu.memory_space<vmem>>, vector<32x32xf32>
    %cst_38 = arith.constant dense<0.000000e+00> : vector<8x32xf32>
    %65 = tpu.matmul %63, %64, %cst_38 {dimension_numbers = #tpu.dot_dimension_numbers<[1], [0], [0], [1], [0, 0, 1, 1], [], []>} : vector<8x32xf32>, vector<32x32xf32>, vector<8x32xf32> -> vector<8x32xf32>
    %66 = arith.addf %62, %65 : vector<8x32xf32>
    %67 = vector.extract_strided_slice %41 {offsets = [48, 0], sizes = [8, 32], strides = [1, 1]} : vector<64x32xf32> to vector<8x32xf32>
    %c296 = arith.constant 296 : index
    %c0_39 = arith.constant 0 : index
    %68 = vector.load %arg3[%c296, %c0_39] : memref<424x128xf32, #tpu.memory_space<vmem>>, vector<32x32xf32>
    %cst_40 = arith.constant dense<0.000000e+00> : vector<8x32xf32>
    %69 = tpu.matmul %67, %68, %cst_40 {dimension_numbers = #tpu.dot_dimension_numbers<[1], [0], [0], [1], [0, 0, 1, 1], [], []>} : vector<8x32xf32>, vector<32x32xf32>, vector<8x32xf32> -> vector<8x32xf32>
    %70 = arith.addf %66, %69 : vector<8x32xf32>
    %71 = vector.extract_strided_slice %41 {offsets = [56, 0], sizes = [8, 32], strides = [1, 1]} : vector<64x32xf32> to vector<8x32xf32>
    %c328 = arith.constant 328 : index
    %c0_41 = arith.constant 0 : index
    %72 = vector.load %arg3[%c328, %c0_41] : memref<424x128xf32, #tpu.memory_space<vmem>>, vector<32x32xf32>
    %cst_42 = arith.constant dense<0.000000e+00> : vector<8x32xf32>
    %73 = tpu.matmul %71, %72, %cst_42 {dimension_numbers = #tpu.dot_dimension_numbers<[1], [0], [0], [1], [0, 0, 1, 1], [], []>} : vector<8x32xf32>, vector<32x32xf32>, vector<8x32xf32> -> vector<8x32xf32>
    %74 = arith.addf %70, %73 : vector<8x32xf32>
    %c4 = arith.constant 4 : index
    %c0_43 = arith.constant 0 : index
    %75 = vector.load %arg4[%c4, %c0_43] : memref<8x128xf32, #tpu.memory_space<vmem>>, vector<1x32xf32>
    %76 = vector.broadcast %75 : vector<1x32xf32> to vector<8x32xf32>
    %77 = arith.addf %74, %76 : vector<8x32xf32>
    %cst_44 = arith.constant 0.000000e+00 : f32
    %78 = vector.broadcast %cst_44 : f32 to vector<8x32xf32>
    %79 = arith.maximumf %77, %78 : vector<8x32xf32>
    %c360 = arith.constant 360 : index
    %c0_45 = arith.constant 0 : index
    %80 = vector.load %arg3[%c360, %c0_45] : memref<424x128xf32, #tpu.memory_space<vmem>>, vector<32x32xf32>
    %cst_46 = arith.constant dense<0.000000e+00> : vector<8x32xf32>
    %81 = tpu.matmul %79, %80, %cst_46 {dimension_numbers = #tpu.dot_dimension_numbers<[1], [0], [0], [1], [0, 0, 1, 1], [], []>} : vector<8x32xf32>, vector<32x32xf32>, vector<8x32xf32> -> vector<8x32xf32>
    %c5 = arith.constant 5 : index
    %c0_47 = arith.constant 0 : index
    %82 = vector.load %arg4[%c5, %c0_47] : memref<8x128xf32, #tpu.memory_space<vmem>>, vector<1x32xf32>
    %83 = vector.broadcast %82 : vector<1x32xf32> to vector<8x32xf32>
    %84 = arith.addf %81, %83 : vector<8x32xf32>
    %cst_48 = arith.constant 0.000000e+00 : f32
    %85 = vector.broadcast %cst_48 : f32 to vector<8x32xf32>
    %86 = arith.maximumf %84, %85 : vector<8x32xf32>
    %c392 = arith.constant 392 : index
    %c0_49 = arith.constant 0 : index
    %87 = vector.load %arg3[%c392, %c0_49] : memref<424x128xf32, #tpu.memory_space<vmem>>, vector<32x128xf32>
    %cst_50 = arith.constant dense<0.000000e+00> : vector<8x128xf32>
    %88 = tpu.matmul %86, %87, %cst_50 {dimension_numbers = #tpu.dot_dimension_numbers<[1], [0], [0], [1], [0, 0, 1, 1], [], []>} : vector<8x32xf32>, vector<32x128xf32>, vector<8x128xf32> -> vector<8x128xf32>
    %c6 = arith.constant 6 : index
    %c0_51 = arith.constant 0 : index
    %89 = vector.load %arg4[%c6, %c0_51] : memref<8x128xf32, #tpu.memory_space<vmem>>, vector<1x128xf32>
    %90 = vector.broadcast %89 : vector<1x128xf32> to vector<8x128xf32>
    %91 = arith.addf %88, %90 : vector<8x128xf32>
    %92 = tpu.iota {dimensions = array<i32: 1>} : vector<8x128xi32>
    %c16_i32 = arith.constant 16 : i32
    %93 = vector.broadcast %c16_i32 : i32 to vector<8x128xi32>
    %94 = arith.cmpi slt, %92, %93 : vector<8x128xi32>
    %cst_52 = arith.constant 0.000000e+00 : f32
    %95 = vector.broadcast %cst_52 : f32 to vector<8x128xf32>
    %96 = arith.maximumf %91, %95 : vector<8x128xf32>
    %97 = vector.broadcast %cst_52 : f32 to vector<8x128xf32>
    %98 = arith.subf %91, %97 : vector<8x128xf32>
    %99 = arith.cmpf one, %98, %98 : vector<8x128xf32>
    %100 = vector.broadcast %cst_52 : f32 to vector<8x128xf32>
    %101 = arith.addf %91, %100 : vector<8x128xf32>
    %102 = math.absf %98 : vector<8x128xf32>
    %cst_53 = arith.constant 0.000000e+00 : f32
    %103 = vector.broadcast %cst_53 : f32 to vector<8x128xf32>
    %104 = arith.subf %103, %102 : vector<8x128xf32>
    %105 = math.exp %104 : vector<8x128xf32>
    %106 = math.log1p %105 : vector<8x128xf32>
    %107 = arith.addf %96, %106 : vector<8x128xf32>
    %108 = arith.select %99, %101, %107 : vector<8x128xi1>, vector<8x128xf32>
    %109 = arith.select %94, %91, %108 : vector<8x128xi1>, vector<8x128xf32>
    %c0_54 = arith.constant 0 : index
    %c0_55 = arith.constant 0 : index
    %110 = vector.load %arg5[%c0_54, %c0_55] : memref<8x128xf32, #tpu.memory_space<vmem>>, vector<8x128xf32>
    tpu.vector_store %arg5[%c0_54, %c0_55], %109 {strides = array<i32>} : memref<8x128xf32, #tpu.memory_space<vmem>>, vector<8x128xf32>,
    return
  }
}

</mosaic_0001>

<bundles_post_ra>
// kernel: tpu_custom_call.1
= control target key start
LH: loop header
LB: loop body
LE: loop exit
PB: predicated region body
PF: predicated region fallthrough
CT: control target
= control target key end

     0   :  { %10 = vsyncpa [#allocation5], 0  ;;  %s1213_s0 = inlined_call_operand.hbm [shape: f32[2], index: 0, kind: input, shape index: {}]   ;;  %s1214_s1 = inlined_call_operand.vmem [shape: f32[64,64], index: 1, kind: input, shape index: {}]   ;;  %s1215_s2 = inlined_call_operand.vmem [shape: f32[64,8], index: 2, kind: input, shape index: {}]   ;;  %s1216_s3 = inlined_call_operand.hbm [shape: f32[424,128], index: 3, kind: input, shape index: {}]   ;;  %s1217_s4 = inlined_call_operand.vmem [shape: f32[8,128], index: 4, kind: input, shape index: {}]   ;;  %s1218_s5 = inlined_call_operand.hbm [shape: f32[8,128], index: 5, kind: output, shape index: {}]  }
   0x1   :  { %11 = vsyncpa [#allocation3], 0 }
   0x2   :  { %12 = vsyncpa [#allocation4], 0  ;;  %s18_s20 = sshll.u32 %s1213_s0, 4  ;;  %s30_s23 = sshll.u32 %s1216_s3, 4  ;;  %s19_s20 = int_to_ptr.hbm [resolvable:$true] %s18_s20  ;;  %s31_s23 = int_to_ptr.hbm [resolvable:$true] %s30_s23 }
   0x3   :  { %s981_s24 = smov [#allocation2]   ;;  %s982_s25 = smov [#allocation6]  }
   0x4   :  { %21 = dma.hbm_to_smem %s19_s20, 16, %s981_s24, [#allocation5]  }
   0x5   :  { %s32_s26 = sshll.u32 %s982_s25, 4  ;;  %s983_s27 = smov 128   ;;  %s33_s26 = int_to_ptr.vmem [resolvable:$true] %s32_s26 }
   0x6   :  { %s984_s28 = smov 8  }
   0x7   :  { %38 = dma.hbm_to_vmem [thread:$0]  %s31_s23, 6784, %s33_s26, [#allocation3], %s983_s27, %s983_s27, %s984_s28  }
   0x8   :  { %975 = dma.done.wait [#allocation5], 16  }
   0x9   :  { %976 = vsyncadd [#allocation5], 4294967280 }
   0xa   :  { %977 = dma.done.wait [#allocation3], 6784  }
   0xb   :  { %978 = vsyncadd [#allocation3], 4294960512 }
   0xc   :  { %49 = sfence }
   0xd   :  { %v1025_v0 = vld [vmem:[%s1215_s2 + $0x38] sm:$0xff]  ;;  %v1030_v1 = vld [vmem:[%s1215_s2 + $0x30] sm:$0xff]  ;;  %v63_v2 = vld [vmem:[%s1215_s2 + $0x28] sm:$0xff]  ;;  %vm77_vm0 = vcmask 523264   ;;  %s66_s6 = sld [smem:[#allocation2]]  ;;  %vm146_vm1 = vcmask 64512  }
   0xe   :  { %110 = vmatpush.msra.mxu0 %v1025_v0  ;;  %v62_v3 = vld [vmem:[%s1215_s2 + $0x20] sm:$0xff]  ;;  %v61_v4 = vld [vmem:[%s1215_s2 + $0x18] sm:$0xff]  ;;  %v60_v5 = vld [vmem:[%s1215_s2 + $0x10] sm:$0xff]  ;;  %vm226_vm2 = vcmask 261120   ;;  %s860_s11 = sld [smem:[#allocation2 + $0x1]]  ;;  %s825_s25 = sshll.u32 %s1218_s5, 4  ;;  %s826_s25 = int_to_ptr.hbm [resolvable:$true] %s825_s25 }
   0xf   :  { %v59_v6 = vld [vmem:[%s1215_s2 + $0x8] sm:$0xff]  ;;  %v58_v7 = vld [vmem:[%s1215_s2] sm:$0xff]  ;;  %v1069_v10 = vld [vmem:[%s1214_s1 + $0x10] sm:$0xff] }
  0x10   :  { %111 = vmatpush.msra.mxu0 %v1030_v1  ;;  %v1055_v8 = vld [vmem:[%s1214_s1] sm:$0xff]  ;;  %v1062_v9 = vld [vmem:[%s1214_s1 + $0x8] sm:$0xff]  ;;  %v1076_v11 = vld [vmem:[%s1214_s1 + $0x18] sm:$0xff] }
  0x11   :  { %v1083_v12 = vld [vmem:[%s1214_s1 + $0x20] sm:$0xff]  ;;  %v1090_v13 = vld [vmem:[%s1214_s1 + $0x28] sm:$0xff]  ;;  %v1097_v14 = vld [vmem:[%s1214_s1 + $0x30] sm:$0xff] }
  0x12   :  { %112 = vmatpush.msra.mxu0 %v63_v2  ;;  %v1104_v15 = vld [vmem:[%s1214_s1 + $0x38] sm:$0xff]  ;;  %v143_v16 = vld [vmem:[#allocation6] sm:$0xff]  ;;  %v221_v44 = vld [vmem:[#allocation6 + $0x10] sm:$0xff] }
  0x13   :  { %186 = vmatpush.msra.mxu1 %v143_v16  ;;  %s67_s7 = sadd.f32 1.0, %s66_s6  ;;  %v223_v30 = vld [vmem:[#allocation6 + $0x20] sm:$0xff]  ;;  %v222_v43 = vld [vmem:[#allocation6 + $0x18] sm:$0xff]  ;;  %v220_v45 = vld [vmem:[#allocation6 + $0x8] sm:$0xff] }
  0x14   :  { %113 = vmatpush.msra.mxu0 %v62_v3  ;;  %895 = vmatpush.msra.mxu2 %v223_v30  ;;  %v904_v46 = vld [vmem:[%s1217_s4] ss:$0 sm:$0xff]  ;;  %s301_s12 = sadd.f32 1.0, %s860_s11 }
  0x15   :  { %v68_v17 = vstv %s67_s7 }
  0x16   :  { %114 = vmatpush.msra.mxu0 %v61_v4  ;;  %v69_v18 = vmul.f32 %v68_v17, %v58_v7  ;;  %v70_v21 = vmul.f32 %v68_v17, %v59_v6  ;;  %v71_v24 = vmul.f32 %v68_v17, %v60_v5  ;;  %v72_v27 = vmul.f32 %v68_v17, %v61_v4 }
  0x17   :  { %v73_v31 = vmul.f32 %v68_v17, %v62_v3  ;;  %v74_v34 = vmul.f32 %v68_v17, %v63_v2  ;;  %v75_v37 = vmul.f32 %v68_v17, %v1030_v1  ;;  %v76_v40 = vmul.f32 %v68_v17, %v1025_v0  ;;  %896 = vmatpush.msra.mxu2 %v222_v43 }
  0x18   :  { %115 = vmatpush.msra.mxu0 %v60_v5 }
  0x19   :  { %897 = vmatpush.msra.mxu2 %v221_v44 }
  0x1a   :  { %116 = vmatpush.msra.mxu0 %v59_v6 }
  0x1b   :  { %898 = vmatpush.msra.mxu2 %v220_v45 }
  0x1c   :  { %117 = vmatpush.msra.mxu0 %v58_v7 }
  0x1d   :  { %836 = vmatmul.msk.f32.vlgmr.msra.gmra.mxu0 %vm77_vm0, %v1055_v8 }
  0x1e   :  { %263 = vmatpush.msrb.mxu0 %v223_v30 }
  0x20   :  { %264 = vmatpush.msrb.mxu0 %v222_v43  ;;  %v352_v43 = vld [vmem:[#allocation6 + $0x28] sm:$0xff] }
  0x22   :  { %265 = vmatpush.msrb.mxu0 %v221_v44 }
  0x24   :  { %266 = vmatpush.msrb.mxu0 %v220_v45 }
  0x25   :  { %837 = vmatmul.msk.f32.gmra.mxu0 %vm77_vm0, %v1062_v9 }
  0x2d   :  { %838 = vmatmul.msk.f32.gmra.mxu0 %vm77_vm0, %v1069_v10 }
  0x35   :  { %839 = vmatmul.msk.f32.gmra.mxu0 %vm77_vm0, %v1076_v11 }
  0x3d   :  { %840 = vmatmul.msk.f32.gmra.mxu0 %vm77_vm0, %v1083_v12 }
  0x45   :  { %841 = vmatmul.msk.f32.gmra.mxu0 %vm77_vm0, %v1090_v13 }
  0x4d   :  { %842 = vmatmul.msk.f32.gmra.mxu0 %vm77_vm0, %v1097_v14 }
  0x55   :  { %843 = vmatmul.msk.f32.gmra.mxu0 %vm77_vm0, %v1104_v15 }
  0x9a   :  { %v119_v19 = vpop.f32.mrf.mxu0 }
  0x9b   :  { %v120_v20 = vadd.f32 %v119_v19, %v69_v18 }
  0x9d   :  { %844 = vmatmul.msk.f32.vlgmr.msra.gmra.mxu1 %vm146_vm1, %v120_v20 }
  0xa2   :  { %v122_v22 = vpop.f32.mrf.mxu0 }
  0xa3   :  { %v123_v23 = vadd.f32 %v122_v22, %v70_v21  ;;  %v905_v21 = vld [vmem:[%s1217_s4 + $0x1] ss:$0 sm:$0xff] }
  0xa5   :  { %845 = vmatmul.msk.f32.gmra.mxu1 %vm146_vm1, %v123_v23 }
  0xaa   :  { %v125_v25 = vpop.f32.mrf.mxu0 }
  0xab   :  { %v126_v26 = vadd.f32 %v125_v25, %v71_v24 }
  0xad   :  { %846 = vmatmul.msk.f32.gmra.mxu1 %vm146_vm1, %v126_v26 }
  0xb2   :  { %v128_v28 = vpop.f32.mrf.mxu0 }
  0xb3   :  { %v129_v29 = vadd.f32 %v128_v28, %v72_v27 }
  0xb5   :  { %847 = vmatmul.msk.f32.gmra.mxu1 %vm146_vm1, %v129_v29 }
  0xba   :  { %v131_v32 = vpop.f32.mrf.mxu0 }
  0xbb   :  { %v132_v33 = vadd.f32 %v131_v32, %v73_v31 }
  0xbd   :  { %848 = vmatmul.msk.f32.gmra.mxu1 %vm146_vm1, %v132_v33 }
  0xc2   :  { %v134_v35 = vpop.f32.mrf.mxu0 }
  0xc3   :  { %v135_v36 = vadd.f32 %v134_v35, %v74_v34 }
  0xc5   :  { %849 = vmatmul.msk.f32.gmra.mxu1 %vm146_vm1, %v135_v36 }
  0xca   :  { %v137_v38 = vpop.f32.mrf.mxu0 }
  0xcb   :  { %v138_v39 = vadd.f32 %v137_v38, %v75_v37 }
  0xcd   :  { %850 = vmatmul.msk.f32.gmra.mxu1 %vm146_vm1, %v138_v39 }
  0xd2   :  { %v140_v41 = vpop.f32.mrf.mxu0 }
  0xd3   :  { %v141_v42 = vadd.f32 %v140_v41, %v76_v40  ;;  %v355_v40 = vld [vmem:[#allocation6 + $0x40] sm:$0xff]  ;;  %v354_v41 = vld [vmem:[#allocation6 + $0x38] sm:$0xff] }
  0xd4   :  { %394 = vmatpush.msrb.mxu1 %v355_v40  ;;  %v515_v40 = vld [vmem:[#allocation6 + $0x90] sm:$0xff] }
  0xd5   :  { %851 = vmatmul.msk.f32.gmra.mxu1 %vm146_vm1, %v141_v42  ;;  %v353_v42 = vld [vmem:[#allocation6 + $0x30] sm:$0xff] }
  0xd6   :  { %395 = vmatpush.msrb.mxu1 %v354_v41  ;;  %v514_v41 = vld [vmem:[#allocation6 + $0x88] sm:$0xff] }
  0xd8   :  { %396 = vmatpush.msrb.mxu1 %v353_v42  ;;  %v567_v42 = vld [vmem:[#allocation6 + $0xc0] sm:$0xff] }
  0xda   :  { %397 = vmatpush.msrb.mxu1 %v352_v43  ;;  %v566_v43 = vld [vmem:[#allocation6 + $0xb8] sm:$0xff] }
 0x11a   :  { %v188_v47 = vpop.f32.mrf.mxu1 }
 0x11b   :  { %v189_v48 = vadd.f32 %v904_v46, %v188_v47 }
 0x11d   :  { %v212_v49 = vmax.f32 %v189_v48, 0.0 }
 0x11f   :  { %852 = vmatmul.msk.f32.vlgmr.msrb.gmra.mxu0 %vm226_vm2, %v212_v49  ;;  %v434_v49 = vld [vmem:[#allocation6 + $0x60] sm:$0xff] }
 0x120   :  { %473 = vmatpush.msrb.mxu2 %v434_v49 }
 0x122   :  { %v191_v50 = vpop.f32.mrf.mxu1 }
 0x123   :  { %v192_v51 = vadd.f32 %v904_v46, %v191_v50  ;;  %v433_v50 = vld [vmem:[#allocation6 + $0x58] sm:$0xff] }
 0x124   :  { %474 = vmatpush.msrb.mxu2 %v433_v50  ;;  %v649_v50 = vld [vmem:[#allocation6 + $0x110] sm:$0xff] }
 0x125   :  { %v213_v52 = vmax.f32 %v192_v51, 0.0  ;;  %v432_v51 = vld [vmem:[#allocation6 + $0x50] sm:$0xff] }
 0x126   :  { %475 = vmatpush.msrb.mxu2 %v432_v51 }
 0x127   :  { %853 = vmatmul.msk.f32.vlgmr.msra.gmra.mxu2 %vm226_vm2, %v213_v52 }
 0x12a   :  { %v194_v53 = vpop.f32.mrf.mxu1 }
 0x12b   :  { %v195_v54 = vadd.f32 %v904_v46, %v194_v53  ;;  %v431_v53 = vld [vmem:[#allocation6 + $0x48] sm:$0xff] }
 0x12c   :  { %476 = vmatpush.msrb.mxu2 %v431_v53  ;;  %v648_v53 = vld [vmem:[#allocation6 + $0x108] sm:$0xff] }
 0x12d   :  { %v214_v55 = vmax.f32 %v195_v54, 0.0 }
 0x12f   :  { %854 = vmatmul.msk.f32.gmra.mxu2 %vm226_vm2, %v214_v55 }
 0x132   :  { %v197_v56 = vpop.f32.mrf.mxu1 }
 0x133   :  { %v198_v57 = vadd.f32 %v904_v46, %v197_v56 }
 0x135   :  { %v215_v58 = vmax.f32 %v198_v57, 0.0 }
 0x137   :  { %855 = vmatmul.msk.f32.gmra.mxu2 %vm226_vm2, %v215_v58 }
 0x13a   :  { %v200_v59 = vpop.f32.mrf.mxu1 }
 0x13b   :  { %v201_v60 = vadd.f32 %v904_v46, %v200_v59 }
 0x13d   :  { %v216_v61 = vmax.f32 %v201_v60, 0.0 }
 0x13f   :  { %856 = vmatmul.msk.f32.gmra.mxu2 %vm226_vm2, %v216_v61 }
 0x142   :  { %v203_v62 = vpop.f32.mrf.mxu1 }
 0x143   :  { %v204_v63 = vadd.f32 %v904_v46, %v203_v62 }
 0x145   :  { %v217_v0 = vmax.f32 %v204_v63, 0.0 }
 0x147   :  { %857 = vmatmul.msk.f32.gmra.mxu2 %vm226_vm2, %v217_v0 }
 0x14a   :  { %v206_v1 = vpop.f32.mrf.mxu1 }
 0x14b   :  { %v207_v2 = vadd.f32 %v904_v46, %v206_v1  ;;  %v906_v1 = vld [vmem:[%s1217_s4 + $0x2] ss:$0 sm:$0xff] }
 0x14d   :  { %v218_v3 = vmax.f32 %v207_v2, 0.0 }
 0x14f   :  { %858 = vmatmul.msk.f32.gmra.mxu2 %vm226_vm2, %v218_v3 }
 0x152   :  { %v209_v4 = vpop.f32.mrf.mxu1 }
 0x153   :  { %v210_v5 = vadd.f32 %v904_v46, %v209_v4 }
 0x155   :  { %v219_v6 = vmax.f32 %v210_v5, 0.0 }
 0x157   :  { %859 = vmatmul.msk.f32.gmra.mxu2 %vm226_vm2, %v219_v6 }
 0x19c   :  { %v268_v33 = vpop.f32.mrf.mxu0 }
 0x19d   :  { %v269_v36 = vadd.f32 %v905_v21, %v268_v33 }
 0x19f   :  { %v292_v39 = vmax.f32 %v269_v36, 0.0  ;;  %v511_v36 = vld [vmem:[#allocation6 + $0x70] sm:$0xff] }
 0x1aa   :  { %v271_v7 = vpop.f32.mrf.mxu2 }
 0x1ab   :  { %v272_v34 = vadd.f32 %v905_v21, %v271_v7 }
 0x1ad   :  { %v293_v38 = vmax.f32 %v272_v34, 0.0 }
 0x1b2   :  { %v274_v16 = vpop.f32.mrf.mxu2 }
 0x1b3   :  { %v275_v31 = vadd.f32 %v905_v21, %v274_v16 }
 0x1b5   :  { %v294_v37 = vmax.f32 %v275_v31, 0.0 }
 0x1ba   :  { %v277_v17 = vpop.f32.mrf.mxu2 }
 0x1bb   :  { %v278_v29 = vadd.f32 %v905_v21, %v277_v17 }
 0x1bd   :  { %v295_v35 = vmax.f32 %v278_v29, 0.0 }
 0x1c2   :  { %v280_v18 = vpop.f32.mrf.mxu2 }
 0x1c3   :  { %v281_v27 = vadd.f32 %v905_v21, %v280_v18 }
 0x1c5   :  { %v296_v32 = vmax.f32 %v281_v27, 0.0 }
 0x1ca   :  { %v283_v19 = vpop.f32.mrf.mxu2 }
 0x1cb   :  { %v1136_v25 = vadd.f32 %v905_v21, %v283_v19 }
 0x1cd   :  { %v297_v30 = vmax.f32 %v1136_v25, 0.0 }
 0x1d2   :  { %v286_v20 = vpop.f32.mrf.mxu2 }
 0x1d3   :  { %v1132_v23 = vadd.f32 %v905_v21, %v286_v20 }
 0x1d5   :  { %v298_v28 = vmax.f32 %v1132_v23, 0.0  ;;  %v512_v23 = vld [vmem:[#allocation6 + $0x78] sm:$0xff] }
 0x1da   :  { %v289_v22 = vpop.f32.mrf.mxu2 }
 0x1db   :  { %v1134_v24 = vadd.f32 %v905_v21, %v289_v22  ;;  %v513_v22 = vld [vmem:[#allocation6 + $0x80] sm:$0xff] }
 0x1dd   :  { %v299_v26 = vmax.f32 %v1134_v24, 0.0 }
 0x1df   :  { %319 = vmatpush.msra.mxu3 %v299_v26 }
 0x1e1   :  { %320 = vmatpush.msra.mxu3 %v298_v28 }
 0x1e3   :  { %321 = vmatpush.msra.mxu3 %v297_v30 }
 0x1e5   :  { %322 = vmatpush.msra.mxu3 %v296_v32 }
 0x1e7   :  { %323 = vmatpush.msra.mxu3 %v295_v35 }
 0x1e9   :  { %324 = vmatpush.msra.mxu3 %v294_v37 }
 0x1eb   :  { %325 = vmatpush.msra.mxu3 %v293_v38 }
 0x1ed   :  { %326 = vmatpush.msra.mxu3 %v292_v39 }
 0x1ee   :  { %861 = vmatmul.msk.f32.vlgmr.msra.gmra.mxu3 %vm77_vm0, %v1055_v8  ;;  %v302_v8 = vstv %s301_s12 }
 0x1ef   :  { %v304_v44 = vmul.f32 %v302_v8, %v293_v38  ;;  %v307_v52 = vmul.f32 %v302_v8, %v296_v32  ;;  %v308_v56 = vmul.f32 %v302_v8, %v297_v30  ;;  %v309_v59 = vmul.f32 %v302_v8, %v298_v28  ;;  %556 = vmatpush.msrb.mxu3 %v513_v22  ;;  %v517_v38 = vld [vmem:[#allocation6 + $0xa0] sm:$0xff] }
 0x1f0   :  { %v310_v62 = vmul.f32 %v302_v8, %v299_v26  ;;  %533 = vmatpush.msra.mxu0 %v517_v38 }
 0x1f1   :  { %557 = vmatpush.msrb.mxu3 %v512_v23 }
 0x1f3   :  { %558 = vmatpush.msrb.mxu3 %v511_v36 }
 0x1f6   :  { %862 = vmatmul.msk.f32.gmra.mxu3 %vm77_vm0, %v1062_v9  ;;  %v303_v9 = vmul.f32 %v302_v8, %v292_v39  ;;  %v516_v39 = vld [vmem:[#allocation6 + $0x98] sm:$0xff] }
 0x1f7   :  { %534 = vmatpush.msra.mxu0 %v516_v39 }
 0x1f9   :  { %535 = vmatpush.msra.mxu0 %v515_v40 }
 0x1fb   :  { %536 = vmatpush.msra.mxu0 %v514_v41 }
 0x1fd   :  { %583 = vmatpush.msrb.mxu0 %v567_v42 }
 0x1fe   :  { %863 = vmatmul.msk.f32.gmra.mxu3 %vm77_vm0, %v1069_v10 }
 0x1ff   :  { %584 = vmatpush.msrb.mxu0 %v566_v43 }
 0x206   :  { %864 = vmatmul.msk.f32.gmra.mxu3 %vm77_vm0, %v1076_v11 }
 0x20e   :  { %865 = vmatmul.msk.f32.gmra.mxu3 %vm77_vm0, %v1083_v12 }
 0x216   :  { %866 = vmatmul.msk.f32.gmra.mxu3 %vm77_vm0, %v1090_v13  ;;  %v305_v13 = vmul.f32 %v302_v8, %v294_v37  ;;  %v510_v37 = vld [vmem:[#allocation6 + $0x68] sm:$0xff] }
 0x217   :  { %559 = vmatpush.msrb.mxu3 %v510_v37 }
 0x21e   :  { %867 = vmatmul.msk.f32.gmra.mxu3 %vm77_vm0, %v1097_v14  ;;  %v306_v14 = vmul.f32 %v302_v8, %v295_v35  ;;  %v565_v8 = vld [vmem:[#allocation6 + $0xb0] sm:$0xff] }
 0x21f   :  { %585 = vmatpush.msrb.mxu0 %v565_v8 }
 0x226   :  { %868 = vmatmul.msk.f32.gmra.mxu3 %vm77_vm0, %v1104_v15 }
 0x271   :  { %v328_v10 = vpop.f32.mrf.mxu3 }
 0x272   :  { %v329_v11 = vadd.f32 %v328_v10, %v303_v9  ;;  %v564_v9 = vld [vmem:[#allocation6 + $0xa8] sm:$0xff]  ;;  %v595_v10 = vld [vmem:[#allocation6 + $0xe0] sm:$0xff] }
 0x273   :  { %586 = vmatpush.msrb.mxu0 %v564_v9  ;;  %611 = vmatpush.msra.mxu3 %v595_v10  ;;  %v908_v10 = vld [vmem:[%s1217_s4 + $0x4] ss:$0 sm:$0xff] }
 0x274   :  { %869 = vmatmul.msk.f32.vlgmr.msrb.gmra.mxu1 %vm226_vm2, %v329_v11  ;;  %v594_v11 = vld [vmem:[#allocation6 + $0xd8] sm:$0xff] }
 0x275   :  { %612 = vmatpush.msra.mxu3 %v594_v11 }
 0x279   :  { %v331_v45 = vpop.f32.mrf.mxu3 }
 0x27a   :  { %v332_v12 = vadd.f32 %v331_v45, %v304_v44  ;;  %v593_v44 = vld [vmem:[#allocation6 + $0xd0] sm:$0xff]  ;;  %v592_v45 = vld [vmem:[#allocation6 + $0xc8] sm:$0xff] }
 0x27b   :  { %613 = vmatpush.msra.mxu3 %v593_v44 }
 0x27c   :  { %870 = vmatmul.msk.f32.gmra.mxu1 %vm226_vm2, %v332_v12  ;;  %v907_v12 = vld [vmem:[%s1217_s4 + $0x3] ss:$0 sm:$0xff] }
 0x27d   :  { %614 = vmatpush.msra.mxu3 %v592_v45 }
 0x281   :  { %v334_v46 = vpop.f32.mrf.mxu3 }
 0x282   :  { %v335_v47 = vadd.f32 %v334_v46, %v305_v13 }
 0x284   :  { %871 = vmatmul.msk.f32.gmra.mxu1 %vm226_vm2, %v335_v47 }
 0x289   :  { %v337_v15 = vpop.f32.mrf.mxu3 }
 0x28a   :  { %v338_v48 = vadd.f32 %v337_v15, %v306_v14  ;;  %v651_v14 = vld [vmem:[#allocation6 + $0x120] sm:$0xff]  ;;  %v650_v15 = vld [vmem:[#allocation6 + $0x118] sm:$0xff] }
 0x28c   :  { %872 = vmatmul.msk.f32.gmra.mxu1 %vm226_vm2, %v338_v48 }
 0x291   :  { %v340_v54 = vpop.f32.mrf.mxu3 }
 0x292   :  { %v341_v55 = vadd.f32 %v340_v54, %v307_v52  ;;  %v623_v52 = vld [vmem:[#allocation6 + $0x100] sm:$0xff]  ;;  %v622_v54 = vld [vmem:[#allocation6 + $0xf8] sm:$0xff] }
 0x294   :  { %873 = vmatmul.msk.f32.gmra.mxu1 %vm226_vm2, %v341_v55  ;;  %v621_v55 = vld [vmem:[#allocation6 + $0xf0] sm:$0xff] }
 0x299   :  { %v343_v57 = vpop.f32.mrf.mxu3 }
 0x29a   :  { %v344_v58 = vadd.f32 %v343_v57, %v308_v56 }
 0x29c   :  { %874 = vmatmul.msk.f32.gmra.mxu1 %vm226_vm2, %v344_v58  ;;  %v620_v58 = vld [vmem:[#allocation6 + $0xe8] sm:$0xff] }
 0x2a1   :  { %v346_v60 = vpop.f32.mrf.mxu3 }
 0x2a2   :  { %v347_v61 = vadd.f32 %v346_v60, %v309_v59  ;;  %v679_v60 = vld [vmem:[#allocation6 + $0x140] sm:$0xff] }
 0x2a4   :  { %875 = vmatmul.msk.f32.gmra.mxu1 %vm226_vm2, %v347_v61  ;;  %v678_v61 = vld [vmem:[#allocation6 + $0x138] sm:$0xff] }
 0x2a9   :  { %v349_v63 = vpop.f32.mrf.mxu3 }
 0x2aa   :  { %v350_v0 = vadd.f32 %v349_v63, %v310_v62  ;;  %v677_v62 = vld [vmem:[#allocation6 + $0x130] sm:$0xff] }
 0x2ac   :  { %876 = vmatmul.msk.f32.gmra.mxu1 %vm226_vm2, %v350_v0 }
 0x2f1   :  { %v399_v2 = vpop.f32.mrf.mxu1 }
 0x2f2   :  { %v400_v3 = vadd.f32 %v906_v1, %v399_v2 }
 0x2f4   :  { %v423_v4 = vmax.f32 %v400_v3, 0.0  ;;  %v707_v3 = vld [vmem:[#allocation6 + $0x160] sm:$0xff] }
 0x2f6   :  { %877 = vmatmul.msk.f32.vlgmr.msrb.gmra.mxu2 %vm226_vm2, %v423_v4  ;;  %v706_v4 = vld [vmem:[#allocation6 + $0x158] sm:$0xff] }
 0x2f9   :  { %v402_v5 = vpop.f32.mrf.mxu1 }
 0x2fa   :  { %v403_v6 = vadd.f32 %v906_v1, %v402_v5  ;;  %v705_v5 = vld [vmem:[#allocation6 + $0x150] sm:$0xff] }
 0x2fc   :  { %v424_v7 = vmax.f32 %v403_v6, 0.0 }
 0x2fe   :  { %878 = vmatmul.msk.f32.gmra.mxu2 %vm226_vm2, %v424_v7 }
 0x301   :  { %v405_v16 = vpop.f32.mrf.mxu1 }
 0x302   :  { %v406_v17 = vadd.f32 %v906_v1, %v405_v16  ;;  %v704_v16 = vld [vmem:[#allocation6 + $0x148] sm:$0xff] }
 0x304   :  { %v425_v18 = vmax.f32 %v406_v17, 0.0 }
 0x306   :  { %879 = vmatmul.msk.f32.gmra.mxu2 %vm226_vm2, %v425_v18 }
 0x309   :  { %v408_v19 = vpop.f32.mrf.mxu1 }
 0x30a   :  { %v409_v20 = vadd.f32 %v906_v1, %v408_v19 }
 0x30c   :  { %v426_v21 = vmax.f32 %v409_v20, 0.0 }
 0x30e   :  { %880 = vmatmul.msk.f32.gmra.mxu2 %vm226_vm2, %v426_v21 }
 0x311   :  { %v411_v24 = vpop.f32.mrf.mxu1 }
 0x312   :  { %v412_v25 = vadd.f32 %v906_v1, %v411_v24 }
 0x314   :  { %v427_v26 = vmax.f32 %v412_v25, 0.0 }
 0x316   :  { %881 = vmatmul.msk.f32.gmra.mxu2 %vm226_vm2, %v427_v26 }
 0x319   :  { %v414_v27 = vpop.f32.mrf.mxu1 }
 0x31a   :  { %v415_v28 = vadd.f32 %v906_v1, %v414_v27  ;;  %v739_v27 = vld [vmem:[#allocation6 + $0x180] sm:$0xff] }
 0x31c   :  { %v428_v29 = vmax.f32 %v415_v28, 0.0  ;;  %v738_v28 = vld [vmem:[#allocation6 + $0x178] sm:$0xff] }
 0x31e   :  { %882 = vmatmul.msk.f32.gmra.mxu2 %vm226_vm2, %v428_v29 }
 0x321   :  { %v417_v30 = vpop.f32.mrf.mxu1 }
 0x322   :  { %v418_v31 = vadd.f32 %v906_v1, %v417_v30  ;;  %v737_v30 = vld [vmem:[#allocation6 + $0x170] sm:$0xff] }
 0x324   :  { %v429_v32 = vmax.f32 %v418_v31, 0.0  ;;  %v736_v31 = vld [vmem:[#allocation6 + $0x168] sm:$0xff] }
 0x326   :  { %883 = vmatmul.msk.f32.gmra.mxu2 %vm226_vm2, %v429_v32  ;;  %v769_v32 = vld [vmem:[#allocation6 + $0x1a0] sm:$0xff] }
 0x329   :  { %v420_v33 = vpop.f32.mrf.mxu1 }
 0x32a   :  { %v421_v34 = vadd.f32 %v906_v1, %v420_v33  ;;  %v676_v1 = vld [vmem:[#allocation6 + $0x128] sm:$0xff]  ;;  %v768_v33 = vld [vmem:[#allocation6 + $0x198] sm:$0xff] }
 0x32c   :  { %v430_v35 = vmax.f32 %v421_v34, 0.0 }
 0x32e   :  { %884 = vmatmul.msk.f32.gmra.mxu2 %vm226_vm2, %v430_v35 }
 0x379   :  { %v478_v13 = vpop.f32.mrf.mxu2 }
 0x37a   :  { %v479_v46 = vadd.f32 %v907_v12, %v478_v13  ;;  %v767_v13 = vld [vmem:[#allocation6 + $0x190] sm:$0xff] }
 0x37c   :  { %v502_v47 = vmax.f32 %v479_v46, 0.0  ;;  %v766_v46 = vld [vmem:[#allocation6 + $0x188] sm:$0xff] }
 0x37e   :  { %886 = vmatmul.msk.f32.vlgmr.msrb.gmra.mxu3 %vm226_vm2, %v502_v47  ;;  %v909_v47 = vld [vmem:[%s1217_s4 + $0x5] ss:$0 sm:$0xff] }
 0x37f   :  { %667 = vmatpush.msrb.mxu3 %v651_v14 }
 0x381   :  { %v481_v48 = vpop.f32.mrf.mxu2  ;;  %668 = vmatpush.msrb.mxu3 %v650_v15 }
 0x382   :  { %v482_v49 = vadd.f32 %v907_v12, %v481_v48 }
 0x383   :  { %669 = vmatpush.msrb.mxu3 %v649_v50 }
 0x384   :  { %v503_v51 = vmax.f32 %v482_v49, 0.0  ;;  %v910_v49 = vld [vmem:[%s1217_s4 + $0x6] ss:$0 sm:$0xff]  ;;  %s985_s4 = smov [#allocation7]  }
 0x385   :  { %670 = vmatpush.msrb.mxu3 %v648_v53  ;;  %s823_s22 = sshll.u32 %s985_s4, 4  ;;  %s824_s22 = int_to_ptr.vmem [resolvable:$true] %s823_s22 }
 0x386   :  { %885 = vmatmul.msk.f32.vlgmr.msra.gmra.mxu0 %vm226_vm2, %v503_v51 }
 0x387   :  { %639 = vmatpush.msra.mxu0 %v623_v52 }
 0x389   :  { %v484_v56 = vpop.f32.mrf.mxu2  ;;  %640 = vmatpush.msra.mxu0 %v622_v54 }
 0x38a   :  { %v485_v57 = vadd.f32 %v907_v12, %v484_v56 }
 0x38b   :  { %641 = vmatpush.msra.mxu0 %v621_v55 }
 0x38c   :  { %v504_v59 = vmax.f32 %v485_v57, 0.0 }
 0x38d   :  { %642 = vmatpush.msra.mxu0 %v620_v58  ;;  %v795_v58 = vlaneseq }
 0x38e   :  { %887 = vmatmul.msk.f32.vlgmr.msrb.gmra.mxu0 %vm226_vm2, %v504_v59 }
 0x38f   :  { %695 = vmatpush.msrb.mxu0 %v679_v60 }
 0x391   :  { %v487_v63 = vpop.f32.mrf.mxu2  ;;  %696 = vmatpush.msrb.mxu0 %v678_v61 }
 0x392   :  { %v488_v0 = vadd.f32 %v907_v12, %v487_v63 }
 0x393   :  { %697 = vmatpush.msrb.mxu0 %v677_v62  ;;  %v796_v62 = vand.u32 127, %v795_v58 }
 0x394   :  { %v505_v2 = vmax.f32 %v488_v0, 0.0 }
 0x395   :  { %698 = vmatpush.msrb.mxu0 %v676_v1  ;;  %vm797_vm4 = vcmp.lt.s32.totalorder %v796_v62, 16 }
 0x396   :  { %888 = vmatmul.msk.f32.vlgmr.msra.gmra.mxu3 %vm226_vm2, %v505_v2 }
 0x397   :  { %723 = vmatpush.msra.mxu3 %v707_v3 }
 0x399   :  { %v490_v6 = vpop.f32.mrf.mxu2  ;;  %724 = vmatpush.msra.mxu3 %v706_v4 }
 0x39a   :  { %v491_v7 = vadd.f32 %v907_v12, %v490_v6 }
 0x39b   :  { %725 = vmatpush.msra.mxu3 %v705_v5 }
 0x39c   :  { %v506_v17 = vmax.f32 %v491_v7, 0.0 }
 0x39d   :  { %726 = vmatpush.msra.mxu3 %v704_v16 }
 0x39e   :  { %889 = vmatmul.msk.f32.vlgmr.msra.gmra.mxu0 %vm226_vm2, %v506_v17 }
 0x39f   :  { %757 = vmatpush.msra.mxu0 %v739_v27 }
 0x3a1   :  { %v493_v18 = vpop.f32.mrf.mxu2  ;;  %758 = vmatpush.msra.mxu0 %v738_v28 }
 0x3a2   :  { %v494_v19 = vadd.f32 %v907_v12, %v493_v18 }
 0x3a3   :  { %759 = vmatpush.msra.mxu0 %v737_v30 }
 0x3a4   :  { %v507_v20 = vmax.f32 %v494_v19, 0.0 }
 0x3a5   :  { %760 = vmatpush.msra.mxu0 %v736_v31 }
 0x3a6   :  { %890 = vmatmul.msk.f32.vlgmr.msrb.gmra.mxu3 %vm226_vm2, %v507_v20 }
 0x3a7   :  { %787 = vmatpush.msrb.mxu3 %v769_v32 }
 0x3a9   :  { %v496_v21 = vpop.f32.mrf.mxu2  ;;  %788 = vmatpush.msrb.mxu3 %v768_v33 }
 0x3aa   :  { %v497_v22 = vadd.f32 %v907_v12, %v496_v21 }
 0x3ab   :  { %789 = vmatpush.msrb.mxu3 %v767_v13 }
 0x3ac   :  { %v508_v23 = vmax.f32 %v497_v22, 0.0 }
 0x3ad   :  { %790 = vmatpush.msrb.mxu3 %v766_v46 }
 0x3ae   :  { %891 = vmatmul.msk.f32.vlgmr.msrb.gmra.mxu0 %vm226_vm2, %v508_v23 }
 0x3b1   :  { %v499_v24 = vpop.f32.mrf.mxu2 }
 0x3b2   :  { %v500_v25 = vadd.f32 %v907_v12, %v499_v24 }
 0x3b4   :  { %v509_v26 = vmax.f32 %v500_v25, 0.0 }
 0x3b6   :  { %892 = vmatmul.msk.f32.vlgmr.msra.gmra.mxu3 %vm226_vm2, %v509_v26 }
 0x401   :  { %v561_v34 = vpop.f32.mrf.mxu3 }
 0x403   :  { %v538_v29 = vpop.f32.mrf.mxu0 }
 0x404   :  { %v562_v37 = vadd.f32 %v561_v34, %v538_v29 }
 0x40b   :  { %v588_v35 = vpop.f32.mrf.mxu0 }
 0x40c   :  { %v591_v38 = vadd.f32 %v588_v35, %v562_v37 }
 0x419   :  { %v616_v36 = vpop.f32.mrf.mxu3 }
 0x41a   :  { %v619_v40 = vadd.f32 %v616_v36, %v591_v38 }
 0x41b   :  { %v644_v39 = vpop.f32.mrf.mxu0 }
 0x41c   :  { %v647_v42 = vadd.f32 %v644_v39, %v619_v40 }
 0x429   :  { %v672_v41 = vpop.f32.mrf.mxu3 }
 0x42a   :  { %v675_v43 = vadd.f32 %v672_v41, %v647_v42 }
 0x42b   :  { %v700_v8 = vpop.f32.mrf.mxu0 }
 0x42c   :  { %v703_v9 = vadd.f32 %v700_v8, %v675_v43 }
 0x439   :  { %v728_v11 = vpop.f32.mrf.mxu3 }
 0x43a   :  { %v731_v44 = vadd.f32 %v728_v11, %v703_v9 }
 0x43c   :  { %v734_v45 = vadd.f32 %v908_v10, %v731_v44 }
 0x43e   :  { %v735_v12 = vmax.f32 %v734_v45, 0.0 }
 0x440   :  { %893 = vmatmul.msk.f32.vlgmr.msra.gmra.mxu0 %vm226_vm2, %v735_v12 }
 0x4bd   :  { %v762_v14 = vpop.f32.mrf.mxu0 }
 0x4be   :  { %v763_v15 = vadd.f32 %v909_v47, %v762_v14 }
 0x4c0   :  { %v765_v48 = vmax.f32 %v763_v15, 0.0 }
 0x4c2   :  { %894 = vmatmul.msk.f32.vlgmr.msrb.gmra.mxu3 %vm226_vm2, %v765_v48 }
 0x545   :  { %v792_v50 = vpop.f32.mrf.mxu3 }
 0x546   :  { %v793_v51 = vadd.f32 %v910_v49, %v792_v50 }
 0x548   :  { %v801_v52 = vand.u32 2147483647, %v793_v51  ;;  %v798_v1 = vmax.f32 %v793_v51, 0.0  ;;  %vm799_vm5 = vcmp.ne.f32.partialorder %v793_v51, %v793_v51 }
 0x54a   :  { %v802_v53 = vsub.f32 0.0, %v801_v52 }
 0x54c   :  { %v803_v54 = vmul.f32 1.442695, %v802_v53 }
 0x54e   :  { %911 = vpow2.f32 %v803_v54 }
 0x554   :  { %v912_v55 = vpop.eup %911 }
 0x555   :  { %v805_v56 = vadd.f32 1.0, %v912_v55  ;;  %v808_v57 = vmul.f32 -0.5, %v912_v55  ;;  %v811_v60 = vand.u32 2147483647, %v912_v55 }
 0x557   :  { %913 = vlog2.f32 %v805_v56  ;;  %v809_v59 = vadd.f32 1.0, %v808_v57  ;;  %vm812_vm3 = vcmp.lt.f32.partialorder %v811_v60, 0.0004427343 }
 0x559   :  { %v810_v0 = vmul.f32 %v912_v55, %v809_v59 }
 0x55d   :  { %v914_v61 = vpop.eup %913 }
 0x55e   :  { %v807_v63 = vmul.f32 0.6931472, %v914_v61 }
 0x560   :  { %v813_v2 = vsel %vm812_vm3, %v810_v0, %v807_v63 }
 0x561   :  { %v814_v3 = vadd.f32 %v813_v2, %v798_v1 }
 0x563   :  { %v815_v4 = vsel %vm799_vm5, %v793_v51, %v814_v3 }
 0x564   :  { %v816_v5 = vsel %vm797_vm4, %v793_v51, %v815_v4 }
 0x565   :  { %817 = vst [vmem:[#allocation7] sm:$0xff] %v816_v5 }
 0x566   :  { %828 = dma.vmem_to_hbm [thread:$0]  %s824_s22, 128, %s826_s25, [#allocation4]  }
 0x567   :  { %979 = dma.done.wait [#allocation4], 128  }
 0x568   :  { %980 = vsyncadd [#allocation4], 4294967168 }
 0x569   :  { %833 = vsyncpa [#allocation3], 1 }
 0x56a   :  { %834 = vsyncpa [#allocation4], 1 }
 0x56b   :  { %835 = vsyncpa [#allocation5], 1 }

</bundles_post_ra>
